<compile_context>
chip_gen: v7x
topology: tpu7x:2x2x1
jax: 0.10.0
libtpu: 0.0.40
codegen_flags: <defaults>
</compile_context>

<pallas_src>
import math
import functools

import jax
import jax.numpy as jnp
from jax import lax
from jax.experimental import pallas as pl
from jax.experimental.pallas import tpu as pltpu


# ---------------- model dims (small, consistent with BertConfig semantics) ---
B = 2          # batch
S = 8          # sequence length
H = 32         # hidden_size
NH = 4         # num_attention_heads
HD = H // NH   # attention_head_size
I = 64         # intermediate_size
M = B * S      # batch folded into the matmul M dimension
LN_EPS = 1e-12
NEG_INF = -10000.0   # additive mask: exp() underflows to exactly 0 in f32

# ---------------- slab layout (one (SLAB_ROWS, 128) f32 operand) -------------
OFF_WQ   = 0                # (H, H)    Wq * 1/sqrt(HD)
OFF_WKVT = OFF_WQ + H       # (2H, H)   [Wk^T ; Wv^T]  (K/V transposed layout)
OFF_WAO  = OFF_WKVT + 2 * H # (H, H)
OFF_WI   = OFF_WAO + H      # (H, I)
OFF_WO   = OFF_WI + H       # (I, H)
OFF_MASK = OFF_WO + I       # (M, M)    block-diagonal additive attention mask
OFF_VEC  = OFF_MASK + M     # (8, 128)  packed bias / LayerNorm rows
ROW_BQ, ROW_BAO, ROW_G1, ROW_BE1, ROW_BI, ROW_BO, ROW_G2, ROW_BE2 = range(8)
SLAB_ROWS = OFF_VEC + 8     # 248 (multiple of 8)
SLAB_LANES = 128


def _layernorm(x, gamma, beta):
    # torch.nn.LayerNorm over last dim, biased variance, eps=1e-12
    mean = jnp.mean(x, axis=-1, keepdims=True)
    var = jnp.mean((x - mean) ** 2, axis=-1, keepdims=True)
    return (x - mean) * lax.rsqrt(var + LN_EPS) * gamma + beta


def _gelu(x):
    # exact erf-based gelu (matches the reference `gelu`)
    return x * 0.5 * (1.0 + lax.erf(x / math.sqrt(2.0)))


def _tree_sum(xs):
    while len(xs) > 1:
        nxt = [xs[i] + xs[i + 1] for i in range(0, len(xs) - 1, 2)]
        if len(xs) % 2:
            nxt.append(xs[-1])
        xs = nxt
    return xs[0]


# ------------------------------ the kernel -----------------------------------
def bert_layer_kernel(x_ref, slab_ref, out_ref, *,
                      hidden, num_heads, head_dim, inter, m):
    x = x_ref[...]                                                  # (M, H)

    # static slab slices: sublane offsets are all multiples of 8 (free)
    wq   = slab_ref[OFF_WQ:OFF_WQ + hidden, :hidden]                # (H, H)
    wkvT = slab_ref[OFF_WKVT:OFF_WKVT + 2 * hidden, :hidden]        # (2H, H)
    wao  = slab_ref[OFF_WAO:OFF_WAO + hidden, :hidden]              # (H, H)
    wi   = slab_ref[OFF_WI:OFF_WI + hidden, :inter]                 # (H, I)
    wo   = slab_ref[OFF_WO:OFF_WO + inter, :hidden]                 # (I, H)
    maskbd = slab_ref[OFF_MASK:OFF_MASK + m, :m]                    # (M, M)
    vec  = slab_ref[OFF_VEC:OFF_VEC + 8, :]                         # (8, 128)
    bq   = vec[ROW_BQ:ROW_BQ + 1, :hidden]     # query bias (pre-scaled)
    bao  = vec[ROW_BAO:ROW_BAO + 1, :hidden]   # att-out bias (+ bv @ Wao fold)
    g1   = vec[ROW_G1:ROW_G1 + 1, :hidden]
    be1  = vec[ROW_BE1:ROW_BE1 + 1, :hidden]
    bi   = vec[ROW_BI:ROW_BI + 1, :inter]
    bo   = vec[ROW_BO:ROW_BO + 1, :hidden]
    g2   = vec[ROW_G2:ROW_G2 + 1, :hidden]
    be2  = vec[ROW_BE2:ROW_BE2 + 1, :hidden]

    # --- projections ---------------------------------------------------------
    # Q in standard layout (scale + bias already folded into wq / bq).
    q = jnp.dot(x, wq, preferred_element_type=jnp.float32) + bq     # (M, H)
    # K/V in transposed layout: features on sublanes, tokens on lanes.
    # Key bias dropped (softmax-invariant); value bias folded into bao.
    kvT = lax.dot_general(wkvT, x, (((1,), (1,)), ((), ())),
                          preferred_element_type=jnp.float32)       # (2H, M)

    # --- per-head attention over the batch-folded token axis ------------------
    head_outs = []
    for h in range(num_heads):                    # static, unrolled
        c0 = h * head_dim
        qh  = q[:, c0:c0 + head_dim]                                # (M, HD)
        kTh = kvT[c0:c0 + head_dim, :]                              # (HD, M)
        vTh = kvT[hidden + c0:hidden + c0 + head_dim, :]            # (HD, M)

        s = jnp.dot(qh, kTh, preferred_element_type=jnp.float32)    # (M, M)
        s = s + maskbd                      # block-diag mask: no cross-batch
        p = jnp.exp(s)                      # masked entries underflow to 0
        # attention-probs dropout: identity (eval mode)
        p = p * pl.reciprocal(jnp.sum(p, axis=-1, keepdims=True))
        ctx = lax.dot_general(p, vTh, (((1,), (1,)), ((), ())),
                              preferred_element_type=jnp.float32)   # (M, HD)
        # fold this head straight into the attention-output projection
        head_outs.append(jnp.dot(ctx, wao[c0:c0 + head_dim, :],
                                 preferred_element_type=jnp.float32))  # (M, H)
    att = _tree_sum(head_outs)                                      # (M, H)

    # --- BertAttOutput: bias + residual + LayerNorm (dropout = identity) ------
    att = _layernorm(att + bao + x, g1, be1)

    # --- BertIntermediate: dense + gelu ---------------------------------------
    inter_act = _gelu(jnp.dot(att, wi, preferred_element_type=jnp.float32) + bi)

    # --- BertOutput: dense + residual + LayerNorm (dropout = identity) --------
    out = jnp.dot(inter_act, wo, preferred_element_type=jnp.float32) + bo
    out_ref[...] = _layernorm(out + att, g2, be2)


# ------------------------- host-side parameter packing -----------------------
def _pad_lanes(a):
    a = a.astype(jnp.float32)
    return jnp.pad(a, ((0, 0), (0, SLAB_LANES - a.shape[1])))


def _vec_row(v):
    v = v.reshape(-1).astype(jnp.float32)
    return jnp.pad(v, (0, SLAB_LANES - v.shape[0]))


def build_slab(p, mask2d):
    """Pack every parameter + the block-diagonal attention mask into one
    (SLAB_ROWS, 128) f32 slab (single DMA)."""
    scale = 1.0 / math.sqrt(HD)
    wq_s = p["wq"] * scale
    bq_s = p["bq"] * scale
    wkvT = jnp.concatenate([p["wk"].T, p["wv"].T], axis=0)          # (2H, H)
    bao_eff = p["bao"] + p["bv"] @ p["wao"]   # fold value bias into att-out bias

    vec = jnp.stack([
        _vec_row(bq_s),        # ROW_BQ
        _vec_row(bao_eff),     # ROW_BAO
        _vec_row(p["g1"]),     # ROW_G1
        _vec_row(p["be1"]),    # ROW_BE1
        _vec_row(p["bi"]),     # ROW_BI
        _vec_row(p["bo"]),     # ROW_BO
        _vec_row(p["g2"]),     # ROW_G2
        _vec_row(p["be2"]),    # ROW_BE2
    ], axis=0)                                                      # (8, 128)

    # block-diagonal additive mask over the batch-folded token axis
    key_mask = mask2d.reshape(-1).astype(jnp.float32)               # (M,)
    blk = jnp.arange(M) // S
    same = blk[:, None] == blk[None, :]
    maskbd = jnp.where(same, key_mask[None, :], jnp.float32(NEG_INF))  # (M, M)

    slab = jnp.concatenate([
        _pad_lanes(wq_s),          # rows OFF_WQ   : +H
        _pad_lanes(wkvT),          # rows OFF_WKVT : +2H
        _pad_lanes(p["wao"]),      # rows OFF_WAO  : +H
        _pad_lanes(p["wi"]),       # rows OFF_WI   : +H
        _pad_lanes(p["wo"]),       # rows OFF_WO   : +I
        _pad_lanes(maskbd),        # rows OFF_MASK : +M
        vec,                       # rows OFF_VEC  : +8
    ], axis=0)
    return slab                                                     # (248, 128)


@jax.jit
def bert_layer(x, mask, params):
    """x: (B, S, H) f32; mask: (B, 1, S) additive attention mask.
    Weights stored [in_features, out_features] (transpose of nn.Linear.weight)."""
    b, s, h = x.shape
    x2d = x.reshape(b * s, h).astype(jnp.float32)
    slab = build_slab(params, mask.reshape(b, s))

    kernel = functools.partial(
        bert_layer_kernel,
        hidden=h, num_heads=NH, head_dim=h // NH, inter=I, m=b * s)

    cost = pl.CostEstimate(
        flops=2 * (M * H * 3 * H + NH * (2 * M * M * HD + M * HD * H)
                   + 2 * M * H * I),
        transcendentals=NH * M * M + M * I,
        bytes_accessed=4 * (2 * M * H + SLAB_ROWS * SLAB_LANES))

    out2d = pl.pallas_call(
        kernel,
        out_shape=jax.ShapeDtypeStruct((b * s, h), jnp.float32),
        in_specs=[pl.BlockSpec(memory_space=pltpu.MemorySpace.VMEM),
                  pl.BlockSpec(memory_space=pltpu.MemorySpace.VMEM)],
        out_specs=pl.BlockSpec(memory_space=pltpu.MemorySpace.VMEM),
        cost_estimate=cost,
        # grid-less call: ~130 KiB of operands live whole in VMEM; single
        # TensorCore (work this small must not be split across cores).
    )(x2d, slab)
    return out2d.reshape(b, s, h)


# ---------------- plain-JAX reference (for a sanity check) -------------------
def bert_layer_ref(x, mask, p):
    s, h = x.shape[1], x.shape[2]
    nh, hd = NH, h // NH

    def one(xb, mb):                      # xb: (S, H), mb: (1, S)
        q = xb @ p["wq"] + p["bq"]
        k = xb @ p["wk"] + p["bk"]
        v = xb @ p["wv"] + p["bv"]
        q = q.reshape(s, nh, hd).transpose(1, 0, 2)
        k = k.reshape(s, nh, hd).transpose(1, 0, 2)
        v = v.reshape(s, nh, hd).transpose(1, 0, 2)
        scores = jnp.einsum("hqd,hkd->hqk", q, k) / math.sqrt(hd) + mb[None]
        probs = jax.nn.softmax(scores, axis=-1)
        ctx = jnp.einsum("hqk,hkd->hqd", probs, v).transpose(1, 0, 2).reshape(s, h)
        att = ctx @ p["wao"] + p["bao"]
        att = _layernorm(att + xb, p["g1"], p["be1"])
        inter = _gelu(att @ p["wi"] + p["bi"])
        out = inter @ p["wo"] + p["bo"]
        return _layernorm(out + att, p["g2"], p["be2"])

    return jax.vmap(one)(x, mask)


if __name__ == "__main__":
    key = jax.random.PRNGKey(0)
    keys = jax.random.split(key, 16)

    def init(k, shape, scale=0.02):
        return (scale * jax.random.normal(k, shape)).astype(jnp.float32)

    params = {
        "wq": init(keys[0], (H, H)),  "bq": init(keys[1], (H,)),
        "wk": init(keys[2], (H, H)),  "bk": init(keys[3], (H,)),
        "wv": init(keys[4], (H, H)),  "bv": init(keys[5], (H,)),
        "wao": init(keys[6], (H, H)), "bao": init(keys[7], (H,)),
        "g1": jnp.ones((H,), jnp.float32), "be1": jnp.zeros((H,), jnp.float32),
        "wi": init(keys[8], (H, I)),  "bi": init(keys[9], (I,)),
        "wo": init(keys[10], (I, H)), "bo": init(keys[11], (H,)),
        "g2": jnp.ones((H,), jnp.float32), "be2": jnp.zeros((H,), jnp.float32),
    }

    x = jax.random.normal(keys[12], (B, S, H), dtype=jnp.float32)
    # additive mask: batch 1 has its last two key positions masked out
    mask = jnp.zeros((B, 1, S), dtype=jnp.float32)
    mask = mask.at[1, 0, -2:].set(NEG_INF)

    out = jax.block_until_ready(bert_layer(x, mask, params))
    ref = bert_layer_ref(x, mask, params)

    assert out.shape == (B, S, H)
    err = float(jnp.max(jnp.abs(out - ref)))
    assert jnp.allclose(out, ref, atol=1e-4, rtol=1e-4), \
        f"mismatch vs reference (max abs err {err})"

    print("KERNEL_OK")
</pallas_src>

<mosaic_0001>
module attributes {stable_mosaic.version = 11 : i64} {
  func.func @bert_layer_kernel(%arg0: memref<16x32xf32, #tpu.memory_space<vmem>>, %arg1: memref<248x128xf32, #tpu.memory_space<vmem>>, %arg2: memref<16x32xf32, #tpu.memory_space<vmem>>) attributes {dimension_semantics = [], scalar_prefetch = 0 : i64, scratch_operands = 0 : i64, tpu.core_type = #tpu.core_type<tc>} {
    %c0 = arith.constant 0 : index
    %c0_0 = arith.constant 0 : index
    %0 = vector.load %arg0[%c0, %c0_0] : memref<16x32xf32, #tpu.memory_space<vmem>>, vector<16x32xf32>
    %c0_1 = arith.constant 0 : index
    %c0_2 = arith.constant 0 : index
    %1 = vector.load %arg1[%c0_1, %c0_2] : memref<248x128xf32, #tpu.memory_space<vmem>>, vector<32x32xf32>
    %c32 = arith.constant 32 : index
    %c0_3 = arith.constant 0 : index
    %2 = vector.load %arg1[%c32, %c0_3] : memref<248x128xf32, #tpu.memory_space<vmem>>, vector<64x32xf32>
    %c96 = arith.constant 96 : index
    %c0_4 = arith.constant 0 : index
    %3 = vector.load %arg1[%c96, %c0_4] : memref<248x128xf32, #tpu.memory_space<vmem>>, vector<32x32xf32>
    %c128 = arith.constant 128 : index
    %c0_5 = arith.constant 0 : index
    %4 = vector.load %arg1[%c128, %c0_5] : memref<248x128xf32, #tpu.memory_space<vmem>>, vector<32x64xf32>
    %c160 = arith.constant 160 : index
    %c0_6 = arith.constant 0 : index
    %5 = vector.load %arg1[%c160, %c0_6] : memref<248x128xf32, #tpu.memory_space<vmem>>, vector<64x32xf32>
    %c224 = arith.constant 224 : index
    %c0_7 = arith.constant 0 : index
    %6 = vector.load %arg1[%c224, %c0_7] : memref<248x128xf32, #tpu.memory_space<vmem>>, vector<16x16xf32>
    %c240 = arith.constant 240 : index
    %c0_8 = arith.constant 0 : index
    %7 = vector.load %arg1[%c240, %c0_8] : memref<248x128xf32, #tpu.memory_space<vmem>>, vector<8x128xf32>
    %8 = vector.extract_strided_slice %7 {offsets = [0, 0], sizes = [1, 32], strides = [1, 1]} : vector<8x128xf32> to vector<1x32xf32>
    %9 = vector.extract_strided_slice %7 {offsets = [1, 0], sizes = [1, 32], strides = [1, 1]} : vector<8x128xf32> to vector<1x32xf32>
    %10 = vector.extract_strided_slice %7 {offsets = [2, 0], sizes = [1, 32], strides = [1, 1]} : vector<8x128xf32> to vector<1x32xf32>
    %11 = vector.extract_strided_slice %7 {offsets = [3, 0], sizes = [1, 32], strides = [1, 1]} : vector<8x128xf32> to vector<1x32xf32>
    %12 = vector.extract_strided_slice %7 {offsets = [4, 0], sizes = [1, 64], strides = [1, 1]} : vector<8x128xf32> to vector<1x64xf32>
    %13 = vector.extract_strided_slice %7 {offsets = [5, 0], sizes = [1, 32], strides = [1, 1]} : vector<8x128xf32> to vector<1x32xf32>
    %14 = vector.extract_strided_slice %7 {offsets = [6, 0], sizes = [1, 32], strides = [1, 1]} : vector<8x128xf32> to vector<1x32xf32>
    %15 = vector.extract_strided_slice %7 {offsets = [7, 0], sizes = [1, 32], strides = [1, 1]} : vector<8x128xf32> to vector<1x32xf32>
    %cst = arith.constant dense<0.000000e+00> : vector<16x32xf32>
    %16 = tpu.matmul %0, %1, %cst {dimension_numbers = #tpu.dot_dimension_numbers<[1], [0], [0], [1], [0, 0, 1, 1], [], []>} : vector<16x32xf32>, vector<32x32xf32>, vector<16x32xf32> -> vector<16x32xf32>
    %17 = vector.broadcast %8 : vector<1x32xf32> to vector<16x32xf32>
    %18 = arith.addf %16, %17 : vector<16x32xf32>
    %cst_9 = arith.constant dense<0.000000e+00> : vector<64x16xf32>
    %19 = tpu.matmul %2, %0, %cst_9 {dimension_numbers = #tpu.dot_dimension_numbers<[1], [1], [0], [0], [0, 0, 1, 0], [], []>} : vector<64x32xf32>, vector<16x32xf32>, vector<64x16xf32> -> vector<64x16xf32>
    %20 = vector.extract_strided_slice %18 {offsets = [0, 0], sizes = [16, 8], strides = [1, 1]} : vector<16x32xf32> to vector<16x8xf32>
    %21 = vector.extract_strided_slice %19 {offsets = [0, 0], sizes = [8, 16], strides = [1, 1]} : vector<64x16xf32> to vector<8x16xf32>
    %22 = vector.extract_strided_slice %19 {offsets = [32, 0], sizes = [8, 16], strides = [1, 1]} : vector<64x16xf32> to vector<8x16xf32>
    %cst_10 = arith.constant dense<0.000000e+00> : vector<16x16xf32>
    %23 = tpu.matmul %20, %21, %cst_10 {dimension_numbers = #tpu.dot_dimension_numbers<[1], [0], [0], [1], [0, 0, 1, 1], [], []>} : vector<16x8xf32>, vector<8x16xf32>, vector<16x16xf32> -> vector<16x16xf32>
    %24 = arith.addf %23, %6 : vector<16x16xf32>
    %25 = math.exp %24 : vector<16x16xf32>
    %cst_11 = arith.constant dense<0.000000e+00> : vector<16xf32>
    %26 = vector.multi_reduction <add>, %25, %cst_11 [1] : vector<16x16xf32> to vector<16xf32>
    %27 = vector.shape_cast %26 : vector<16xf32> to vector<16x1xf32>
    %28 = tpu.reciprocal %27 : vector<16x1xf32> -> vector<16x1xf32>
    %29 = vector.broadcast %28 : vector<16x1xf32> to vector<16x16xf32>
    %30 = arith.mulf %25, %29 : vector<16x16xf32>
    %cst_12 = arith.constant dense<0.000000e+00> : vector<16x8xf32>
    %31 = tpu.matmul %30, %22, %cst_12 {dimension_numbers = #tpu.dot_dimension_numbers<[1], [1], [0], [0], [0, 0, 1, 0], [], []>} : vector<16x16xf32>, vector<8x16xf32>, vector<16x8xf32> -> vector<16x8xf32>
    %32 = vector.extract_strided_slice %3 {offsets = [0, 0], sizes = [8, 32], strides = [1, 1]} : vector<32x32xf32> to vector<8x32xf32>
    %cst_13 = arith.constant dense<0.000000e+00> : vector<16x32xf32>
    %33 = tpu.matmul %31, %32, %cst_13 {dimension_numbers = #tpu.dot_dimension_numbers<[1], [0], [0], [1], [0, 0, 1, 1], [], []>} : vector<16x8xf32>, vector<8x32xf32>, vector<16x32xf32> -> vector<16x32xf32>
    %34 = vector.extract_strided_slice %18 {offsets = [0, 8], sizes = [16, 8], strides = [1, 1]} : vector<16x32xf32> to vector<16x8xf32>
    %35 = vector.extract_strided_slice %19 {offsets = [8, 0], sizes = [8, 16], strides = [1, 1]} : vector<64x16xf32> to vector<8x16xf32>
    %36 = vector.extract_strided_slice %19 {offsets = [40, 0], sizes = [8, 16], strides = [1, 1]} : vector<64x16xf32> to vector<8x16xf32>
    %cst_14 = arith.constant dense<0.000000e+00> : vector<16x16xf32>
    %37 = tpu.matmul %34, %35, %cst_14 {dimension_numbers = #tpu.dot_dimension_numbers<[1], [0], [0], [1], [0, 0, 1, 1], [], []>} : vector<16x8xf32>, vector<8x16xf32>, vector<16x16xf32> -> vector<16x16xf32>
    %38 = arith.addf %37, %6 : vector<16x16xf32>
    %39 = math.exp %38 : vector<16x16xf32>
    %cst_15 = arith.constant dense<0.000000e+00> : vector<16xf32>
    %40 = vector.multi_reduction <add>, %39, %cst_15 [1] : vector<16x16xf32> to vector<16xf32>
    %41 = vector.shape_cast %40 : vector<16xf32> to vector<16x1xf32>
    %42 = tpu.reciprocal %41 : vector<16x1xf32> -> vector<16x1xf32>
    %43 = vector.broadcast %42 : vector<16x1xf32> to vector<16x16xf32>
    %44 = arith.mulf %39, %43 : vector<16x16xf32>
    %cst_16 = arith.constant dense<0.000000e+00> : vector<16x8xf32>
    %45 = tpu.matmul %44, %36, %cst_16 {dimension_numbers = #tpu.dot_dimension_numbers<[1], [1], [0], [0], [0, 0, 1, 0], [], []>} : vector<16x16xf32>, vector<8x16xf32>, vector<16x8xf32> -> vector<16x8xf32>
    %46 = vector.extract_strided_slice %3 {offsets = [8, 0], sizes = [8, 32], strides = [1, 1]} : vector<32x32xf32> to vector<8x32xf32>
    %cst_17 = arith.constant dense<0.000000e+00> : vector<16x32xf32>
    %47 = tpu.matmul %45, %46, %cst_17 {dimension_numbers = #tpu.dot_dimension_numbers<[1], [0], [0], [1], [0, 0, 1, 1], [], []>} : vector<16x8xf32>, vector<8x32xf32>, vector<16x32xf32> -> vector<16x32xf32>
    %48 = vector.extract_strided_slice %18 {offsets = [0, 16], sizes = [16, 8], strides = [1, 1]} : vector<16x32xf32> to vector<16x8xf32>
    %49 = vector.extract_strided_slice %19 {offsets = [16, 0], sizes = [8, 16], strides = [1, 1]} : vector<64x16xf32> to vector<8x16xf32>
    %50 = vector.extract_strided_slice %19 {offsets = [48, 0], sizes = [8, 16], strides = [1, 1]} : vector<64x16xf32> to vector<8x16xf32>
    %cst_18 = arith.constant dense<0.000000e+00> : vector<16x16xf32>
    %51 = tpu.matmul %48, %49, %cst_18 {dimension_numbers = #tpu.dot_dimension_numbers<[1], [0], [0], [1], [0, 0, 1, 1], [], []>} : vector<16x8xf32>, vector<8x16xf32>, vector<16x16xf32> -> vector<16x16xf32>
    %52 = arith.addf %51, %6 : vector<16x16xf32>
    %53 = math.exp %52 : vector<16x16xf32>
    %cst_19 = arith.constant dense<0.000000e+00> : vector<16xf32>
    %54 = vector.multi_reduction <add>, %53, %cst_19 [1] : vector<16x16xf32> to vector<16xf32>
    %55 = vector.shape_cast %54 : vector<16xf32> to vector<16x1xf32>
    %56 = tpu.reciprocal %55 : vector<16x1xf32> -> vector<16x1xf32>
    %57 = vector.broadcast %56 : vector<16x1xf32> to vector<16x16xf32>
    %58 = arith.mulf %53, %57 : vector<16x16xf32>
    %cst_20 = arith.constant dense<0.000000e+00> : vector<16x8xf32>
    %59 = tpu.matmul %58, %50, %cst_20 {dimension_numbers = #tpu.dot_dimension_numbers<[1], [1], [0], [0], [0, 0, 1, 0], [], []>} : vector<16x16xf32>, vector<8x16xf32>, vector<16x8xf32> -> vector<16x8xf32>
    %60 = vector.extract_strided_slice %3 {offsets = [16, 0], sizes = [8, 32], strides = [1, 1]} : vector<32x32xf32> to vector<8x32xf32>
    %cst_21 = arith.constant dense<0.000000e+00> : vector<16x32xf32>
    %61 = tpu.matmul %59, %60, %cst_21 {dimension_numbers = #tpu.dot_dimension_numbers<[1], [0], [0], [1], [0, 0, 1, 1], [], []>} : vector<16x8xf32>, vector<8x32xf32>, vector<16x32xf32> -> vector<16x32xf32>
    %62 = vector.extract_strided_slice %18 {offsets = [0, 24], sizes = [16, 8], strides = [1, 1]} : vector<16x32xf32> to vector<16x8xf32>
    %63 = vector.extract_strided_slice %19 {offsets = [24, 0], sizes = [8, 16], strides = [1, 1]} : vector<64x16xf32> to vector<8x16xf32>
    %64 = vector.extract_strided_slice %19 {offsets = [56, 0], sizes = [8, 16], strides = [1, 1]} : vector<64x16xf32> to vector<8x16xf32>
    %cst_22 = arith.constant dense<0.000000e+00> : vector<16x16xf32>
    %65 = tpu.matmul %62, %63, %cst_22 {dimension_numbers = #tpu.dot_dimension_numbers<[1], [0], [0], [1], [0, 0, 1, 1], [], []>} : vector<16x8xf32>, vector<8x16xf32>, vector<16x16xf32> -> vector<16x16xf32>
    %66 = arith.addf %65, %6 : vector<16x16xf32>
    %67 = math.exp %66 : vector<16x16xf32>
    %cst_23 = arith.constant dense<0.000000e+00> : vector<16xf32>
    %68 = vector.multi_reduction <add>, %67, %cst_23 [1] : vector<16x16xf32> to vector<16xf32>
    %69 = vector.shape_cast %68 : vector<16xf32> to vector<16x1xf32>
    %70 = tpu.reciprocal %69 : vector<16x1xf32> -> vector<16x1xf32>
    %71 = vector.broadcast %70 : vector<16x1xf32> to vector<16x16xf32>
    %72 = arith.mulf %67, %71 : vector<16x16xf32>
    %cst_24 = arith.constant dense<0.000000e+00> : vector<16x8xf32>
    %73 = tpu.matmul %72, %64, %cst_24 {dimension_numbers = #tpu.dot_dimension_numbers<[1], [1], [0], [0], [0, 0, 1, 0], [], []>} : vector<16x16xf32>, vector<8x16xf32>, vector<16x8xf32> -> vector<16x8xf32>
    %74 = vector.extract_strided_slice %3 {offsets = [24, 0], sizes = [8, 32], strides = [1, 1]} : vector<32x32xf32> to vector<8x32xf32>
    %cst_25 = arith.constant dense<0.000000e+00> : vector<16x32xf32>
    %75 = tpu.matmul %73, %74, %cst_25 {dimension_numbers = #tpu.dot_dimension_numbers<[1], [0], [0], [1], [0, 0, 1, 1], [], []>} : vector<16x8xf32>, vector<8x32xf32>, vector<16x32xf32> -> vector<16x32xf32>
    %76 = arith.addf %33, %47 : vector<16x32xf32>
    %77 = arith.addf %61, %75 : vector<16x32xf32>
    %78 = arith.addf %76, %77 : vector<16x32xf32>
    %79 = vector.broadcast %9 : vector<1x32xf32> to vector<16x32xf32>
    %80 = arith.addf %78, %79 : vector<16x32xf32>
    %81 = arith.addf %80, %0 : vector<16x32xf32>
    %cst_26 = arith.constant dense<0.000000e+00> : vector<16xf32>
    %82 = vector.multi_reduction <add>, %81, %cst_26 [1] : vector<16x32xf32> to vector<16xf32>
    %83 = vector.shape_cast %82 : vector<16xf32> to vector<16x1xf32>
    %cst_27 = arith.constant 3.200000e+01 : f32
    %84 = vector.broadcast %cst_27 : f32 to vector<16x1xf32>
    %85 = arith.divf %83, %84 : vector<16x1xf32>
    %86 = vector.broadcast %85 : vector<16x1xf32> to vector<16x32xf32>
    %87 = arith.subf %81, %86 : vector<16x32xf32>
    %88 = arith.mulf %87, %87 : vector<16x32xf32>
    %cst_28 = arith.constant dense<0.000000e+00> : vector<16xf32>
    %89 = vector.multi_reduction <add>, %88, %cst_28 [1] : vector<16x32xf32> to vector<16xf32>
    %90 = vector.shape_cast %89 : vector<16xf32> to vector<16x1xf32>
    %cst_29 = arith.constant 3.200000e+01 : f32
    %91 = vector.broadcast %cst_29 : f32 to vector<16x1xf32>
    %92 = arith.divf %90, %91 : vector<16x1xf32>
    %93 = vector.broadcast %85 : vector<16x1xf32> to vector<16x32xf32>
    %94 = arith.subf %81, %93 : vector<16x32xf32>
    %cst_30 = arith.constant 9.99999996E-13 : f32
    %95 = vector.broadcast %cst_30 : f32 to vector<16x1xf32>
    %96 = arith.addf %92, %95 : vector<16x1xf32>
    %97 = math.rsqrt %96 : vector<16x1xf32>
    %98 = vector.broadcast %97 : vector<16x1xf32> to vector<16x32xf32>
    %99 = arith.mulf %94, %98 : vector<16x32xf32>
    %100 = vector.broadcast %10 : vector<1x32xf32> to vector<16x32xf32>
    %101 = arith.mulf %99, %100 : vector<16x32xf32>
    %102 = vector.broadcast %11 : vector<1x32xf32> to vector<16x32xf32>
    %103 = arith.addf %101, %102 : vector<16x32xf32>
    %cst_31 = arith.constant dense<0.000000e+00> : vector<16x64xf32>
    %104 = tpu.matmul %103, %4, %cst_31 {dimension_numbers = #tpu.dot_dimension_numbers<[1], [0], [0], [1], [0, 0, 1, 1], [], []>} : vector<16x32xf32>, vector<32x64xf32>, vector<16x64xf32> -> vector<16x64xf32>
    %105 = vector.broadcast %12 : vector<1x64xf32> to vector<16x64xf32>
    %106 = arith.addf %104, %105 : vector<16x64xf32>
    %cst_32 = arith.constant 5.000000e-01 : f32
    %107 = vector.broadcast %cst_32 : f32 to vector<16x64xf32>
    %108 = arith.mulf %106, %107 : vector<16x64xf32>
    %cst_33 = arith.constant 1.41421354 : f32
    %109 = vector.broadcast %cst_33 : f32 to vector<16x64xf32>
    %110 = arith.divf %106, %109 : vector<16x64xf32>
    %111 = math.erf %110 : vector<16x64xf32>
    %cst_34 = arith.constant 1.000000e+00 : f32
    %112 = vector.broadcast %cst_34 : f32 to vector<16x64xf32>
    %113 = arith.addf %112, %111 : vector<16x64xf32>
    %114 = arith.mulf %108, %113 : vector<16x64xf32>
    %cst_35 = arith.constant dense<0.000000e+00> : vector<16x32xf32>
    %115 = tpu.matmul %114, %5, %cst_35 {dimension_numbers = #tpu.dot_dimension_numbers<[1], [0], [0], [1], [0, 0, 1, 1], [], []>} : vector<16x64xf32>, vector<64x32xf32>, vector<16x32xf32> -> vector<16x32xf32>
    %116 = vector.broadcast %13 : vector<1x32xf32> to vector<16x32xf32>
    %117 = arith.addf %115, %116 : vector<16x32xf32>
    %118 = arith.addf %117, %103 : vector<16x32xf32>
    %cst_36 = arith.constant dense<0.000000e+00> : vector<16xf32>
    %119 = vector.multi_reduction <add>, %118, %cst_36 [1] : vector<16x32xf32> to vector<16xf32>
    %120 = vector.shape_cast %119 : vector<16xf32> to vector<16x1xf32>
    %cst_37 = arith.constant 3.200000e+01 : f32
    %121 = vector.broadcast %cst_37 : f32 to vector<16x1xf32>
    %122 = arith.divf %120, %121 : vector<16x1xf32>
    %123 = vector.broadcast %122 : vector<16x1xf32> to vector<16x32xf32>
    %124 = arith.subf %118, %123 : vector<16x32xf32>
    %125 = arith.mulf %124, %124 : vector<16x32xf32>
    %cst_38 = arith.constant dense<0.000000e+00> : vector<16xf32>
    %126 = vector.multi_reduction <add>, %125, %cst_38 [1] : vector<16x32xf32> to vector<16xf32>
    %127 = vector.shape_cast %126 : vector<16xf32> to vector<16x1xf32>
    %cst_39 = arith.constant 3.200000e+01 : f32
    %128 = vector.broadcast %cst_39 : f32 to vector<16x1xf32>
    %129 = arith.divf %127, %128 : vector<16x1xf32>
    %130 = vector.broadcast %122 : vector<16x1xf32> to vector<16x32xf32>
    %131 = arith.subf %118, %130 : vector<16x32xf32>
    %cst_40 = arith.constant 9.99999996E-13 : f32
    %132 = vector.broadcast %cst_40 : f32 to vector<16x1xf32>
    %133 = arith.addf %129, %132 : vector<16x1xf32>
    %134 = math.rsqrt %133 : vector<16x1xf32>
    %135 = vector.broadcast %134 : vector<16x1xf32> to vector<16x32xf32>
    %136 = arith.mulf %131, %135 : vector<16x32xf32>
    %137 = vector.broadcast %14 : vector<1x32xf32> to vector<16x32xf32>
    %138 = arith.mulf %136, %137 : vector<16x32xf32>
    %139 = vector.broadcast %15 : vector<1x32xf32> to vector<16x32xf32>
    %140 = arith.addf %138, %139 : vector<16x32xf32>
    %c0_41 = arith.constant 0 : index
    %c0_42 = arith.constant 0 : index
    %141 = vector.load %arg2[%c0_41, %c0_42] : memref<16x32xf32, #tpu.memory_space<vmem>>, vector<16x32xf32>
    tpu.vector_store %arg2[%c0_41, %c0_42], %140 {strides = array<i32>} : memref<16x32xf32, #tpu.memory_space<vmem>>, vector<16x32xf32>,
    return
  }
}

</mosaic_0001>

<bundles_post_ra>
// kernel: bert_layer.1
= control target key start
LH: loop header
LB: loop body
LE: loop exit
PB: predicated region body
PF: predicated region fallthrough
CT: control target
= control target key end

     0   :  { %vm49_vm0 = vcmask 261120   ;;  %s2214_s0 = inlined_call_operand.vmem [shape: f32[16,32], index: 0, kind: input, shape index: {}]   ;;  %s2215_s1 = inlined_call_operand.vmem [shape: f32[248,128], index: 1, kind: input, shape index: {}]   ;;  %s2216_s2 = inlined_call_operand.hbm [shape: f32[16,32], index: 2, kind: output, shape index: {}]  }
   0x1   :  { %v14_v0 = vld [vmem:[%s2215_s1] sm:$0xff]  ;;  %v15_v1 = vld [vmem:[%s2215_s1 + $0x8] sm:$0xff]  ;;  %v16_v2 = vld [vmem:[%s2215_s1 + $0x10] sm:$0xff] }
   0x2   :  { %v1826_v3 = vpack.c.bf16 %v15_v1, %v14_v0  ;;  %v17_v4 = vld [vmem:[%s2215_s1 + $0x18] sm:$0xff]  ;;  %v1980_v5 = vld [vmem:[%s2214_s0] sm:$0xff]  ;;  %v1987_v7 = vld [vmem:[%s2214_s0 + $0x8] sm:$0xff] }
   0x3   :  { %v1830_v6 = vpack.c.bf16 %v17_v4, %v16_v2  ;;  %1717 = vmatprep.mubr.msk.f32.mxu1 %vm49_vm0, %v1980_v5 }
   0x4   :  { %1827 = vmatprep.subr.bf16.mxu1 %v1826_v3 }
   0x5   :  { %1829 = vmatpush3.bf16.msra.mxu1 %v1826_v3 }
   0x6   :  { %7 = vsyncpa [#allocation3], 0  ;;  %1831 = vmatprep.subr.bf16.mxu1 %v1830_v6  ;;  %v1834_v8 = vpack.c.bf16 %v1987_v7, %v1980_v5  ;;  %v18_v9 = vld [vmem:[%s2215_s1 + $0x20] sm:$0xff]  ;;  %v19_v10 = vld [vmem:[%s2215_s1 + $0x28] sm:$0xff]  ;;  %v45_v15 = vlaneseq  ;;  %vm260_vm2 = vcmask 64512   ;;  %s1944_s6 = smov 120  }
   0x7   :  { %vm1835_vm1 = vmpackc.low %vm49_vm0, %vm49_vm0  ;;  %v20_v11 = vld [vmem:[%s2215_s1 + $0x30] sm:$0xff]  ;;  %v21_v12 = vld [vmem:[%s2215_s1 + $0x38] sm:$0xff]  ;;  %vm346_vm3 = vcmask 130048   ;;  %s1945_s11 = smov 112   ;;  %s1946_s14 = smov 104   ;;  %vm1457_vm4 = vcmask 523264  }
   0x8   :  { %v22_v13 = vld [vmem:[%s2215_s1 + $0x40] sm:$0xff]  ;;  %v23_v14 = vld [vmem:[%s2215_s1 + $0x48] sm:$0xff]  ;;  %v2019_v16 = vshrl.u32 %v45_v15, 7  ;;  %v2025_v18 = vld [vmem:[%s2215_s1 + $0xf0] sm:$0xff] }
   0x9   :  { %1833 = vmatpush3.bf16.msra.mxu1 %v1830_v6  ;;  %v2047_v30 = vld [vmem:[%s2215_s1 + $0xe8] sm:$0xff]  ;;  %v2052_v31 = vld [vmem:[%s2215_s1 + $0xe0] sm:$0xff]  ;;  %v24_v6 = vld [vmem:[%s2215_s1 + $0x50] sm:$0xff] }
   0xa   :  { %1836 = vmatprep.subr.msk.bf16.mxu1 %vm1835_vm1, %v1834_v8  ;;  %v47_v17 = vsub.s32 0, %v2019_v16  ;;  %v27_v62 = vld [vmem:[%s2215_s1 + $0x68] sm:$0xff] }
   0xc   :  { %1718 = vmatmul.mubr.msk.f32.vlgmr.msra.gmra.mrb[0].mxu1 %vm49_vm0, %v1987_v7  ;;  %v48_v19 = vrot.slane %v2025_v18, %v47_v17 }
   0xd   :  { %1724 = vmatprep.mubr.msk.f32.mxu1 %vm49_vm0, %v18_v9 }
  0x12   :  { %1839 = vmatpush3.bf16.xpose.msk.msra.mxu1 %vm1835_vm1, %v1834_v8  ;;  %v25_v8 = vld [vmem:[%s2215_s1 + $0x58] sm:$0xff] }
  0x19   :  { %1725 = vmatmul.mubr.msk.f32.vlgmr.msra.gmra.mrb[2].mxu1 %vm49_vm0, %v19_v10 }
  0x1a   :  { %1727 = vmatprep.mubr.msk.f32.mxu1 %vm49_vm0, %v20_v11 }
  0x1d   :  { %1728 = vmatmul.mubr.msk.f32.gmra.mrb[4].mxu1 %vm49_vm0, %v21_v12 }
  0x1e   :  { %1730 = vmatprep.mubr.msk.f32.mxu1 %vm49_vm0, %v22_v13 }
  0x21   :  { %1731 = vmatmul.mubr.msk.f32.gmra.mrb[6].mxu1 %vm49_vm0, %v23_v14 }
  0x22   :  { %1733 = vmatprep.mubr.msk.f32.mxu1 %vm49_vm0, %v24_v6 }
  0x25   :  { %1734 = vmatmul.mubr.msk.f32.gmra.mrb[8].mxu1 %vm49_vm0, %v25_v8 }
  0xdf   :  { %v1719_v20 = vpop.f32.mrb[0].mxu1 }
  0xe0   :  { %v122_v21 = vpop.f32.mrb[1].mxu1  ;;  %v2030_v23 = vadd.f32 %v1719_v20, %v48_v19 }
  0xe1   :  { %v2028_v22 = vadd.f32 %v122_v21, %v48_v19 }
  0xe3   :  { %441 = vrot.lane.b32.xlu1 %v2028_v22, %s1944_s6  ;;  %1738 = vmatprep.mubr.msk.f32.mxu0 %vm260_vm2, %v2028_v22 }
  0xe7   :  { %443 = vrot.lane.b32.xlu1 %v2030_v23, %s1944_s6 }
  0xec   :  { %v1726_v24 = vpop.f32.mrb[2].mxu1 }
  0xed   :  { %v221_v25 = vpop.f32.mrb[3].mxu1 }
  0xee   :  { %1736 = vmatprep.subr.mxu0 %v221_v25 }
  0xef   :  { %1737 = vmatpush3.msra.mxu0 %v221_v25 }
  0xf0   :  { %1739 = vmatmul.mubr.msk.f32.vlgmr.msra.gmra.mrb[0].mxu0 %vm260_vm2, %v2030_v23  ;;  %v2038_v26 = vpop.f32.mrb[4].mxu1 }
  0xf1   :  { %v2040_v27 = vpop.f32.mrb[5].mxu1 }
  0xf4   :  { %v1732_v28 = vpop.f32.mrb[6].mxu1 }
  0xf5   :  { %v241_v29 = vpop.f32.mrb[7].mxu1 }
  0xf6   :  { %1741 = vmatprep.subr.msk.mxu0 %vm346_vm3, %v241_v29 }
  0xf7   :  { %1742 = vmatpush3.xpose.msk.msra.mxu0 %vm346_vm3, %v241_v29 }
  0xf8   :  { %1746 = vmatprep.subr.mxu0 %v1726_v24  ;;  %v1735_v15 = vpop.f32.mrb[8].mxu1 }
  0xf9   :  { %v251_v17 = vpop.f32.mrb[9].mxu1 }
  0xfa   :  { %1766 = vmatprep.subr.msk.mxu1 %vm346_vm3, %v251_v17 }
  0xfb   :  { %1767 = vmatpush3.xpose.msk.msra.mxu1 %vm346_vm3, %v251_v17 }
  0xfc   :  { %1776 = vmatprep.subr.msk.mxu1 %vm346_vm3, %v1735_v15 }
 0x155   :  { %v442_v47 = vpop.permute.xlu1 %441 }
 0x159   :  { %v444_v49 = vpop.permute.xlu1 %443 }
 0x1c3   :  { %v1740_v32 = vpop.f32.mrb[0].mxu0 }
 0x1c4   :  { %v339_v33 = vadd.f32 %v1740_v32, %v2047_v30  ;;  %v333_v34 = vpop.f32.mrb[1].mxu0 }
 0x1c5   :  { %v334_v35 = vadd.f32 %v333_v34, %v2052_v31 }
 0x1c6   :  { %v344_v36 = vmul.f32 1.442695, %v339_v33 }
 0x1c7   :  { %v342_v37 = vmul.f32 1.442695, %v334_v35 }
 0x1c9   :  { %1876 = vpow2.f32 %v342_v37 }
 0x1ca   :  { %1878 = vpow2.f32 %v344_v36 }
 0x1d3   :  { %v1877_v38 = vpop.eup %1876 }
 0x1d4   :  { %v347_v39 = vsel %vm346_vm3, %v1877_v38, 0.0  ;;  %v1879_v40 = vpop.eup %1878 }
 0x1d5   :  { %348 = vadd.xlane.f32.xlu0 %v347_v39  ;;  %v350_v41 = vsel %vm346_vm3, %v1879_v40, 0.0 }
 0x1d9   :  { %351 = vadd.xlane.f32.xlu0 %v350_v41 }
 0x262   :  { %v349_v42 = vpop.xlane.xlu0 %348 }
 0x263   :  { %1880 = vrcp.f32 %v349_v42 }
 0x266   :  { %v352_v43 = vpop.xlane.xlu0 %351 }
 0x267   :  { %1882 = vrcp.f32 %v352_v43 }
 0x26d   :  { %v1881_v44 = vpop.eup %1880 }
 0x26e   :  { %v355_v45 = vmul.f32 %v1881_v44, %v1877_v38 }
 0x270   :  { %1743 = vmatprep.mubr.msk.f32.mxu0 %vm346_vm3, %v355_v45 }
 0x271   :  { %v1883_v46 = vpop.eup %1882 }
 0x272   :  { %v356_v48 = vmul.f32 %v1883_v46, %v1879_v40 }
 0x274   :  { %1744 = vmatmul.mubr.msk.f32.vlgmr.msra.gmra.mrb[2].mxu0 %vm346_vm3, %v356_v48 }
 0x275   :  { %1747 = vmatpush3.msra.mxu0 %v1726_v24  ;;  %1748 = vmatprep.mubr.msk.f32.mxu0 %vm260_vm2, %v442_v47 }
 0x276   :  { %1751 = vmatprep.subr.msk.mxu0 %vm346_vm3, %v1732_v28 }
 0x278   :  { %1749 = vmatmul.mubr.msk.f32.vlgmr.msra.gmra.mrb[4].mxu0 %vm260_vm2, %v444_v49 }
 0x27c   :  { %1752 = vmatpush3.xpose.msk.msra.mxu0 %vm346_vm3, %v1732_v28 }
 0x27d   :  { %1756 = vmatprep.subr.mxu0 %v27_v62 }
 0x347   :  { %v2064_v50 = vpop.f32.mrb[2].mxu0 }
 0x348   :  { %v2066_v51 = vpop.f32.mrb[3].mxu0 }
 0x34b   :  { %v1750_v52 = vpop.f32.mrb[4].mxu0 }
 0x34c   :  { %v521_v53 = vadd.f32 %v1750_v52, %v2047_v30  ;;  %v515_v54 = vpop.f32.mrb[5].mxu0 }
 0x34d   :  { %v516_v55 = vadd.f32 %v515_v54, %v2052_v31 }
 0x34e   :  { %v526_v56 = vmul.f32 1.442695, %v521_v53 }
 0x34f   :  { %v524_v57 = vmul.f32 1.442695, %v516_v55  ;;  %v29_v55 = vld [vmem:[%s2215_s1 + $0x78] sm:$0xff] }
 0x350   :  { %1884 = vpow2.f32 %v526_v56  ;;  %v26_v56 = vld [vmem:[%s2215_s1 + $0x60] sm:$0xff] }
 0x351   :  { %1886 = vpow2.f32 %v524_v57 }
 0x35a   :  { %v1885_v58 = vpop.eup %1884 }
 0x35b   :  { %v1887_v59 = vpop.eup %1886  ;;  %v531_v60 = vsel %vm346_vm3, %v1885_v58, 0.0 }
 0x35c   :  { %532 = vadd.xlane.f32.xlu1 %v531_v60  ;;  %v528_v61 = vsel %vm346_vm3, %v1887_v59, 0.0 }
 0x35d   :  { %529 = vadd.xlane.f32.xlu0 %v528_v61  ;;  %v28_v61 = vld [vmem:[%s2215_s1 + $0x70] sm:$0xff] }
 0x373   :  { %703 = vrot.lane.b32.xlu0 %v2028_v22, %s1945_s11 }
 0x377   :  { %705 = vrot.lane.b32.xlu0 %v2030_v23, %s1945_s11 }
 0x37b   :  { %884 = vrot.lane.b32.xlu0 %v2028_v22, %s1946_s14 }
 0x37f   :  { %886 = vrot.lane.b32.xlu0 %v2030_v23, %s1946_s14 }
 0x3e9   :  { %v533_v63 = vpop.xlane.xlu1 %532 }
 0x3ea   :  { %1888 = vrcp.f32 %v533_v63  ;;  %v530_v0 = vpop.xlane.xlu0 %529 }
 0x3eb   :  { %1890 = vrcp.f32 %v530_v0 }
 0x3ee   :  { %v704_v9 = vpop.permute.xlu0 %703 }
 0x3f2   :  { %v706_v10 = vpop.permute.xlu0 %705 }
 0x3f4   :  { %v1889_v1 = vpop.eup %1888 }
 0x3f5   :  { %v1891_v2 = vpop.eup %1890  ;;  %v537_v4 = vmul.f32 %v1889_v1, %v1885_v58 }
 0x3f6   :  { %v536_v3 = vmul.f32 %v1891_v2, %v1887_v59  ;;  %v885_v13 = vpop.permute.xlu0 %884 }
 0x3f8   :  { %1753 = vmatprep.mubr.msk.f32.mxu0 %vm346_vm3, %v536_v3 }
 0x3f9   :  { %1754 = vmatmul.mubr.msk.f32.vlgmr.msra.gmra.mrb[6].mxu0 %vm346_vm3, %v537_v4 }
 0x3fa   :  { %1757 = vmatpush3.msra.mxu0 %v27_v62  ;;  %v887_v14 = vpop.permute.xlu0 %886  ;;  %v1312_v62 = vsub.s32 1, %v2019_v16 }
 0x3fb   :  { %1761 = vmatprep.subr.mxu0 %v2040_v27 }
 0x3fc   :  { %v1313_v0 = vrot.slane %v2025_v18, %v1312_v62 }
 0x4cc   :  { %v1755_v11 = vpop.f32.mrb[6].mxu0 }
 0x4cd   :  { %v613_v12 = vpop.f32.mrb[7].mxu0 }
 0x4ce   :  { %1758 = vmatprep.mubr.msk.f32.mxu0 %vm260_vm2, %v613_v12 }
 0x4cf   :  { %1759 = vmatmul.mubr.msk.f32.vlgmr.msra.gmra.mrb[8].mxu0 %vm260_vm2, %v1755_v11 }
 0x4d0   :  { %1762 = vmatpush3.msra.mxu0 %v2040_v27  ;;  %1763 = vmatprep.mubr.msk.f32.mxu0 %vm260_vm2, %v704_v9 }
 0x4d1   :  { %1771 = vmatprep.subr.mxu0 %v2038_v26 }
 0x4d3   :  { %1764 = vmatmul.mubr.msk.f32.vlgmr.msra.gmra.mrb[10].mxu0 %vm260_vm2, %v706_v10 }
 0x4d4   :  { %1772 = vmatpush3.msra.mxu0 %v2038_v26  ;;  %1773 = vmatprep.mubr.msk.f32.mxu0 %vm260_vm2, %v885_v13 }
 0x4d7   :  { %1774 = vmatmul.mubr.msk.f32.vlgmr.msra.gmra.mrb[12].mxu0 %vm260_vm2, %v887_v14 }
 0x5a2   :  { %v2102_v19 = vpop.f32.mrb[8].mxu0 }
 0x5a3   :  { %v2104_v20 = vpop.f32.mrb[9].mxu0 }
 0x5a6   :  { %v1765_v21 = vpop.f32.mrb[10].mxu0 }
 0x5a7   :  { %v783_v22 = vadd.f32 %v1765_v21, %v2047_v30  ;;  %v777_v23 = vpop.f32.mrb[11].mxu0  ;;  %v31_v21 = vld [vmem:[%s2215_s1 + $0x88] sm:$0xff] }
 0x5a8   :  { %v778_v24 = vadd.f32 %v777_v23, %v2052_v31  ;;  %v32_v23 = vld [vmem:[%s2215_s1 + $0x90] sm:$0xff] }
 0x5a9   :  { %v788_v25 = vmul.f32 1.442695, %v783_v22 }
 0x5aa   :  { %v786_v26 = vmul.f32 1.442695, %v778_v24  ;;  %v1775_v27 = vpop.f32.mrb[12].mxu0  ;;  %v33_v24 = vld [vmem:[%s2215_s1 + $0x98] sm:$0xff] }
 0x5ab   :  { %1892 = vpow2.f32 %v788_v25  ;;  %v964_v28 = vadd.f32 %v1775_v27, %v2047_v30  ;;  %v958_v29 = vpop.f32.mrb[13].mxu0  ;;  %v1844_v25 = vpack.c.bf16 %v33_v24, %v32_v23 }
 0x5ac   :  { %1894 = vpow2.f32 %v786_v26  ;;  %v959_v32 = vadd.f32 %v958_v29, %v2052_v31 }
 0x5ad   :  { %v969_v33 = vmul.f32 1.442695, %v964_v28 }
 0x5ae   :  { %v967_v34 = vmul.f32 1.442695, %v959_v32 }
 0x5b0   :  { %1896 = vpow2.f32 %v967_v34  ;;  %v1347_v34 = vsub.s32 2, %v2019_v16 }
 0x5b1   :  { %1898 = vpow2.f32 %v969_v33 }
 0x5b5   :  { %v1893_v35 = vpop.eup %1892 }
 0x5b6   :  { %v1895_v36 = vpop.eup %1894  ;;  %v793_v37 = vsel %vm346_vm3, %v1893_v35, 0.0 }
 0x5b7   :  { %794 = vadd.xlane.f32.xlu0 %v793_v37  ;;  %v790_v38 = vsel %vm346_vm3, %v1895_v36, 0.0 }
 0x5b8   :  { %791 = vadd.xlane.f32.xlu1 %v790_v38 }
 0x5ba   :  { %v1897_v39 = vpop.eup %1896 }
 0x5bb   :  { %v971_v40 = vsel %vm346_vm3, %v1897_v39, 0.0  ;;  %v1899_v30 = vpop.eup %1898 }
 0x5bc   :  { %972 = vadd.xlane.f32.xlu1 %v971_v40  ;;  %v974_v41 = vsel %vm346_vm3, %v1899_v30, 0.0 }
 0x5c0   :  { %975 = vadd.xlane.f32.xlu1 %v974_v41 }
 0x644   :  { %v795_v31 = vpop.xlane.xlu0 %794 }
 0x645   :  { %1900 = vrcp.f32 %v795_v31  ;;  %v792_v42 = vpop.xlane.xlu1 %791 }
 0x646   :  { %1902 = vrcp.f32 %v792_v42 }
 0x649   :  { %v973_v43 = vpop.xlane.xlu1 %972 }
 0x64a   :  { %1904 = vrcp.f32 %v973_v43 }
 0x64d   :  { %v976_v44 = vpop.xlane.xlu1 %975 }
 0x64e   :  { %1906 = vrcp.f32 %v976_v44  ;;  %v34_v44 = vld [vmem:[%s2215_s1 + $0xa0] sm:$0xff] }
 0x64f   :  { %v1901_v45 = vpop.eup %1900 }
 0x650   :  { %v1903_v46 = vpop.eup %1902  ;;  %v799_v48 = vmul.f32 %v1901_v45, %v1893_v35  ;;  %v1353_v35 = vsub.s32 3, %v2019_v16  ;;  %v35_v45 = vld [vmem:[%s2215_s1 + $0xa8] sm:$0xff] }
 0x651   :  { %v798_v47 = vmul.f32 %v1903_v46, %v1895_v36  ;;  %v1348_v36 = vrot.slane %v2025_v18, %v1347_v34  ;;  %v1848_v46 = vpack.c.bf16 %v35_v45, %v34_v44 }
 0x653   :  { %1768 = vmatprep.mubr.msk.f32.mxu1 %vm346_vm3, %v798_v47  ;;  %v36_v47 = vld [vmem:[%s2215_s1 + $0xb0] sm:$0xff] }
 0x654   :  { %v1905_v49 = vpop.eup %1904  ;;  %1769 = vmatmul.mubr.msk.f32.vlgmr.msra.gmra.mrb[10].mxu1 %vm346_vm3, %v799_v48  ;;  %v37_v48 = vld [vmem:[%s2215_s1 + $0xb8] sm:$0xff] }
 0x655   :  { %1777 = vmatpush3.xpose.msk.msra.mxu1 %vm346_vm3, %v1735_v15  ;;  %v979_v52 = vmul.f32 %v1905_v49, %v1897_v39  ;;  %v1354_v39 = vrot.slane %v2025_v18, %v1353_v35  ;;  %v1852_v49 = vpack.c.bf16 %v37_v48, %v36_v47 }
 0x656   :  { %1781 = vmatprep.subr.mxu1 %v29_v55 }
 0x657   :  { %1778 = vmatprep.mubr.msk.f32.mxu1 %vm346_vm3, %v979_v52  ;;  %v38_v52 = vld [vmem:[%s2215_s1 + $0xc0] sm:$0xff] }
 0x658   :  { %v1907_v53 = vpop.eup %1906 }
 0x659   :  { %v980_v54 = vmul.f32 %v1907_v53, %v1899_v30  ;;  %v39_v53 = vld [vmem:[%s2215_s1 + $0xc8] sm:$0xff] }
 0x65b   :  { %1779 = vmatmul.mubr.msk.f32.vlgmr.msra.gmra.mrb[12].mxu1 %vm346_vm3, %v980_v54  ;;  %v1856_v54 = vpack.c.bf16 %v39_v53, %v38_v52 }
 0x65c   :  { %1782 = vmatpush3.msra.mxu1 %v29_v55  ;;  %v40_v55 = vld [vmem:[%s2215_s1 + $0xd0] sm:$0xff] }
 0x65d   :  { %1786 = vmatprep.subr.mxu1 %v26_v56 }
 0x727   :  { %v1770_v57 = vpop.f32.mrb[10].mxu1 }
 0x728   :  { %v875_v58 = vpop.f32.mrb[11].mxu1 }
 0x72e   :  { %v1780_v59 = vpop.f32.mrb[12].mxu1 }
 0x72f   :  { %v1056_v60 = vpop.f32.mrb[13].mxu1 }
 0x730   :  { %1783 = vmatprep.mubr.msk.f32.mxu1 %vm260_vm2, %v1056_v60 }
 0x731   :  { %1784 = vmatmul.mubr.msk.f32.vlgmr.msra.gmra.mrb[14].mxu1 %vm260_vm2, %v1780_v59 }
 0x732   :  { %1787 = vmatpush3.msra.mxu1 %v26_v56  ;;  %1788 = vmatprep.mubr.msk.f32.mxu1 %vm260_vm2, %v2066_v51  ;;  %v41_v56 = vld [vmem:[%s2215_s1 + $0xd8] sm:$0xff] }
 0x733   :  { %1791 = vmatprep.subr.mxu1 %v28_v61 }
 0x739   :  { %1789 = vmatmul.mubr.msk.f32.vlgmr.msra.gmra.mrb[14].mxu1 %vm260_vm2, %v2064_v50 }
 0x73a   :  { %1792 = vmatpush3.msra.mxu1 %v28_v61  ;;  %1793 = vmatprep.mubr.msk.f32.mxu1 %vm260_vm2, %v875_v58  ;;  %v1359_v58 = vsub.s32 4, %v2019_v16 }
 0x73c   :  { %v1360_v59 = vrot.slane %v2025_v18, %v1359_v58 }
 0x741   :  { %1794 = vmatmul.mubr.msk.f32.vlgmr.msra.gmra.mrb[14].mxu1 %vm260_vm2, %v1770_v57  ;;  %v1860_v57 = vpack.c.bf16 %v41_v56, %v40_v55 }
 0x814   :  { %v1795_v63 = vpop.f32.mrb[14].mxu1 }
 0x815   :  { %v1864_v1 = vadd.f32 %v1795_v63, %v2102_v19  ;;  %v1299_v2 = vpop.f32.mrb[15].mxu1 }
 0x816   :  { %v1865_v3 = vadd.f32 %v1299_v2, %v2104_v20 }
 0x817   :  { %v1315_v51 = vadd.f32 %v1864_v1, %v1313_v0 }
 0x818   :  { %v1314_v4 = vadd.f32 %v1865_v3, %v1313_v0 }
 0x819   :  { %v1317_v8 = vadd.f32 %v1315_v51, %v1987_v7  ;;  %v30_v7 = vld [vmem:[%s2215_s1 + $0x80] sm:$0xff]  ;;  %s1947_s1 = smov [#allocation2]  }
 0x81a   :  { %v1316_v6 = vadd.f32 %v1314_v4, %v1980_v5  ;;  %v1840_v22 = vpack.c.bf16 %v31_v21, %v30_v7  ;;  %s1586_s20 = sshll.u32 %s1947_s1, 4  ;;  %s1587_s20 = int_to_ptr.vmem [resolvable:$true] %s1586_s20 }
 0x81b   :  { %v1321_v9 = vsel %vm49_vm0, %v1317_v8, 0.0  ;;  %s1920_s21 = scalar_lea.vmem %s1587_s20, 256  ;;  %p1925_p1 = scmp.lt.s32.totalorder %s1587_s20, %s1587_s20 }
 0x81c   :  { %v1318_v50 = vsel %vm49_vm0, %v1316_v6, 0.0  ;;  %1841 = vmatprep.subr.bf16.mxu0 %v1840_v22  ;;  %p1921_p0 = scmp.ne.s32.totalorder %s1587_s20, %s1920_s21  ;;  %p1926_p2 = scmp.lt.s32.totalorder %s1920_s21, %s1920_s21 }
 0x81d   :  { %1319 = vadd.xlane.f32.xlu1 %v1318_v50  ;;  %1843 = vmatpush3.bf16.msra.mxu0 %v1840_v22 }
 0x81e   :  { %1845 = vmatprep.subr.bf16.mxu0 %v1844_v25  ;;  %p1927_p3 = por %p1926_p2, %p1925_p1 }
 0x820   :  { %p1928_p4 = pnand %p1927_p3, %p1921_p0 }
 0x821   :  { %1322 = vadd.xlane.f32.xlu1 %v1321_v9  ;;  %1847 = vmatpush3.bf16.msra.mxu0 %v1844_v25 }
 0x822   :  { %1849 = vmatprep.subr.bf16.mxu0 %v1848_v46 }
 0x8aa   :  { %v1320_v10 = vpop.xlane.xlu1 %1319 }
 0x8ab   :  { %v1325_v11 = vmul.f32 0.03125, %v1320_v10  ;;  %v1455_v10 = vsub.s32 5, %v2019_v16 }
 0x8ad   :  { %v1327_v12 = vsub.f32 %v1316_v6, %v1325_v11  ;;  %v1456_v11 = vrot.slane %v2025_v18, %v1455_v10 }
 0x8ae   :  { %v1323_v13 = vpop.xlane.xlu1 %1322 }
 0x8af   :  { %v1326_v14 = vmul.f32 0.03125, %v1323_v13  ;;  %v1329_v15 = vmul.f32 %v1327_v12, %v1327_v12 }
 0x8b1   :  { %v1328_v17 = vsub.f32 %v1317_v8, %v1326_v14  ;;  %v1331_v19 = vsel %vm49_vm0, %v1329_v15, 0.0 }
 0x8b2   :  { %1332 = vadd.xlane.f32.xlu1 %v1331_v19 }
 0x8b3   :  { %v1330_v20 = vmul.f32 %v1328_v17, %v1328_v17 }
 0x8b5   :  { %v1334_v5 = vsel %vm49_vm0, %v1330_v20, 0.0 }
 0x8b6   :  { %1335 = vadd.xlane.f32.xlu1 %v1334_v5 }
 0x93f   :  { %v1333_v26 = vpop.xlane.xlu1 %1332 }
 0x940   :  { %v1337_v27 = vmul.f32 0.03125, %v1333_v26 }
 0x942   :  { %v1339_v28 = vadd.f32 1e-12, %v1337_v27 }
 0x943   :  { %v1336_v29 = vpop.xlane.xlu1 %1335 }
 0x944   :  { %1908 = vrsqrt.f32 %v1339_v28  ;;  %v1338_v32 = vmul.f32 0.03125, %v1336_v29 }
 0x946   :  { %v1340_v33 = vadd.f32 1e-12, %v1338_v32 }
 0x948   :  { %1910 = vrsqrt.f32 %v1340_v33 }
 0x94e   :  { %v1909_v37 = vpop.eup %1908 }
 0x94f   :  { %v1343_v38 = vmul.f32 %v1909_v37, %v1327_v12 }
 0x951   :  { %v1349_v40 = vmul.f32 %v1348_v36, %v1343_v38  ;;  %v1569_v38 = vsub.s32 6, %v2019_v16 }
 0x952   :  { %v1911_v30 = vpop.eup %1910 }
 0x953   :  { %v1344_v41 = vmul.f32 %v1911_v30, %v1328_v17  ;;  %v1355_v31 = vadd.f32 %v1354_v39, %v1349_v40  ;;  %v1570_v40 = vrot.slane %v2025_v18, %v1569_v38 }
 0x955   :  { %v1350_v42 = vmul.f32 %v1348_v36, %v1344_v41  ;;  %1804 = vmatprep.mubr.msk.f32.mxu0 %vm49_vm0, %v1355_v31 }
 0x957   :  { %v1356_v43 = vadd.f32 %v1354_v39, %v1350_v42  ;;  %v1575_v39 = vsub.s32 7, %v2019_v16 }
 0x959   :  { %1805 = vmatmul.mubr.msk.f32.vlgmr.msra.gmra.mrb[14].mxu0 %vm49_vm0, %v1356_v43 }
 0x95a   :  { %1851 = vmatpush3.bf16.msra.mxu0 %v1848_v46 }
 0x95b   :  { %1853 = vmatprep.subr.bf16.mxu0 %v1852_v49 }
 0x95e   :  { %1855 = vmatpush3.bf16.msra.mxu0 %v1852_v49 }
 0x95f   :  { %1857 = vmatprep.subr.bf16.mxu0 %v1856_v54 }
 0x962   :  { %1859 = vmatpush3.bf16.msra.mxu0 %v1856_v54 }
 0x963   :  { %1861 = vmatprep.subr.bf16.mxu0 %v1860_v57 }
 0x966   :  { %1863 = vmatpush3.bf16.msra.mxu0 %v1860_v57 }
 0xa2c   :  { %v1806_v60 = vpop.f32.mrb[14].mxu0 }
 0xa2d   :  { %v1439_v61 = vadd.f32 %v1806_v60, %v1360_v59  ;;  %v1433_v62 = vpop.f32.mrb[15].mxu0 }
 0xa2e   :  { %v1434_v63 = vadd.f32 %v1433_v62, %v1360_v59 }
 0xa2f   :  { %v1446_v0 = vmul.f32 0.70710677, %v1439_v61  ;;  %v1443_v50 = vmul.f32 0.5, %v1439_v61 }
 0xa30   :  { %v1445_v1 = vmul.f32 0.70710677, %v1434_v63  ;;  %v1442_v4 = vmul.f32 0.5, %v1434_v63 }
 0xa31   :  { %1912 = verf.f32 %v1446_v0 }
 0xa32   :  { %1914 = verf.f32 %v1445_v1 }
 0xa3b   :  { %v1913_v2 = vpop.eup %1912 }
 0xa3c   :  { %v1915_v3 = vpop.eup %1914  ;;  %v1450_v51 = vadd.f32 1.0, %v1913_v2 }
 0xa3d   :  { %v1449_v6 = vadd.f32 1.0, %v1915_v3 }
 0xa3e   :  { %v1452_v9 = vmul.f32 %v1450_v51, %v1443_v50 }
 0xa3f   :  { %v1451_v8 = vmul.f32 %v1449_v6, %v1442_v4 }
 0xa41   :  { %1823 = vmatprep.mubr.msk.f32.mxu0 %vm1457_vm4, %v1451_v8 }
 0xa42   :  { %1824 = vmatmul.mubr.msk.f32.vlgmr.msra.gmra.mrb[16].mxu0 %vm1457_vm4, %v1452_v9 }
 0xb15   :  { %v1825_v12 = vpop.f32.mrb[16].mxu0 }
 0xb16   :  { %v1530_v13 = vpop.f32.mrb[17].mxu0  ;;  %v1536_v14 = vadd.f32 %v1825_v12, %v1456_v11 }
 0xb17   :  { %v1531_v15 = vadd.f32 %v1530_v13, %v1456_v11 }
 0xb18   :  { %v1540_v20 = vadd.f32 %v1536_v14, %v1356_v43 }
 0xb19   :  { %v1539_v17 = vadd.f32 %v1531_v15, %v1355_v31  ;;  %v1576_v31 = vrot.slane %v2025_v18, %v1575_v39 }
 0xb1a   :  { %v1544_v5 = vsel %vm49_vm0, %v1540_v20, 0.0 }
 0xb1b   :  { %v1541_v19 = vsel %vm49_vm0, %v1539_v17, 0.0 }
 0xb1c   :  { %1542 = vadd.xlane.f32.xlu1 %v1541_v19 }
 0xb20   :  { %1545 = vadd.xlane.f32.xlu1 %v1544_v5 }
 0xba9   :  { %v1543_v7 = vpop.xlane.xlu1 %1542 }
 0xbaa   :  { %v1547_v21 = vmul.f32 0.03125, %v1543_v7 }
 0xbac   :  { %v1549_v22 = vsub.f32 %v1539_v17, %v1547_v21 }
 0xbad   :  { %v1546_v23 = vpop.xlane.xlu1 %1545 }
 0xbae   :  { %v1548_v24 = vmul.f32 0.03125, %v1546_v23  ;;  %v1551_v25 = vmul.f32 %v1549_v22, %v1549_v22 }
 0xbb0   :  { %v1550_v26 = vsub.f32 %v1540_v20, %v1548_v24  ;;  %v1553_v27 = vsel %vm49_vm0, %v1551_v25, 0.0 }
 0xbb1   :  { %1554 = vadd.xlane.f32.xlu0 %v1553_v27 }
 0xbb2   :  { %v1552_v28 = vmul.f32 %v1550_v26, %v1550_v26 }
 0xbb4   :  { %v1556_v29 = vsel %vm49_vm0, %v1552_v28, 0.0 }
 0xbb5   :  { %1557 = vadd.xlane.f32.xlu1 %v1556_v29 }
 0xc3e   :  { %v1555_v32 = vpop.xlane.xlu0 %1554 }
 0xc3f   :  { %v1559_v33 = vmul.f32 0.03125, %v1555_v32 }
 0xc41   :  { %v1561_v34 = vadd.f32 1e-12, %v1559_v33 }
 0xc42   :  { %v1558_v35 = vpop.xlane.xlu1 %1557 }
 0xc43   :  { %1916 = vrsqrt.f32 %v1561_v34  ;;  %v1560_v36 = vmul.f32 0.03125, %v1558_v35 }
 0xc45   :  { %v1562_v37 = vadd.f32 1e-12, %v1560_v36 }
 0xc47   :  { %1918 = vrsqrt.f32 %v1562_v37 }
 0xc4d   :  { %v1917_v30 = vpop.eup %1916 }
 0xc4e   :  { %v1565_v41 = vmul.f32 %v1917_v30, %v1549_v22 }
 0xc50   :  { %v1571_v42 = vmul.f32 %v1570_v40, %v1565_v41 }
 0xc51   :  { %v1919_v43 = vpop.eup %1918 }
 0xc52   :  { %v1566_v44 = vmul.f32 %v1919_v43, %v1550_v26  ;;  %v1577_v45 = vadd.f32 %v1576_v31, %v1571_v42 }
 0xc54   :  { %v1572_v46 = vmul.f32 %v1570_v40, %v1566_v44  ;;  %1579 = vst.msk [vmem:[#allocation2] sm:$0xff] %vm49_vm0, %v1577_v45 }
 0xc56   :  { %v1578_v47 = vadd.f32 %v1576_v31, %v1572_v46 }
 0xc58   :  { %1580 = vst.msk [vmem:[#allocation2 + $0x8] sm:$0xff] %vm49_vm0, %v1578_v47 }
 0xc59   :  { %1931 = shalt.err (!%p1928_p4)
}
 0xc5a   :  { %s1932_s23 = scalar_lea.hbm %s2216_s2, 256 }
 0xc5b   :  { %p1933_p5 = scmp.ne.s32.totalorder %s2216_s2, %s1932_s23  ;;  %p1936_p6 = scmp.lt.u32.totalorder %s1932_s23, %s2216_s2 }
 0xc5d   :  { %p1938_p7 = pnand %p1936_p6, %p1933_p5 }
 0xc5f   :  { %1941 = shalt.err (!%p1938_p7)
}
 0xc60   :  { %s1948_s28 = smov 128   ;;  %s1949_s29 = smov 8  }
 0xc61   :  { %1592 = dma.vmem_to_hbm [thread:$0]  %s1587_s20, 256, %s2216_s2, [#allocation3], %s1948_s28, %s1948_s28, %s1949_s29  }
 0xc62   :  { %1942 = dma.done.wait [#allocation3], 256  }
 0xc63   :  { %1943 = vsyncadd [#allocation3], 4294967040 }
 0xc64   :  { %1596 = vsyncpa [#allocation3], 1 }

</bundles_post_ra>
